<compile_context>
chip_gen: v5e
topology: v5e:2x2
jax: 0.10.0
libtpu: 0.0.40
codegen_flags: <defaults>
</compile_context>

<pallas_src>
import math
import functools

import jax
import jax.numpy as jnp
from jax.experimental import pallas as pl
from jax.experimental.pallas import tpu as pltpu


def _vmem_capacity_bytes():
    """Trace-time VMEM capacity query; conservative fallback (v7x-sized) if unavailable."""
    try:
        return int(pltpu.get_tpu_info().vmem_capacity_bytes)
    except Exception:
        return 64 * 1024 * 1024


# ----------------------------- Pallas kernels ------------------------------ #

def _linear_kernel(x_ref, w_ref, b_ref, o_ref):
    # x: (tm, In), w: (In, tn) -- both already in compute dtype; b: (1, tn) f32.
    acc = jnp.dot(x_ref[...], w_ref[...], preferred_element_type=jnp.float32)
    o_ref[...] = (acc + b_ref[...]).astype(o_ref.dtype)


def pallas_linear(x2d, w, b, *, out_dtype, tile_m=None, tile_n=512):
    """y = x2d @ w + b.  Weight is DMA'd once (resident), rows are streamed."""
    n, k_in = x2d.shape
    n_out = w.shape[1]
    if tile_m is None:
        tile_m = 512 if _vmem_capacity_bytes() >= 100 * 1024 * 1024 else 256
    tm = n if n <= tile_m else tile_m
    w_bytes = k_in * n_out * jnp.dtype(w.dtype).itemsize

    if w_bytes <= 6 * 1024 * 1024:
        # Whole weight resident in VMEM with a constant block index -> Pallas DMAs it
        # exactly once instead of once per row tile.
        grid = (pl.cdiv(n, tm),)
        in_specs = [
            pl.BlockSpec((tm, k_in), lambda i: (i, 0)),
            pl.BlockSpec((k_in, n_out), lambda i: (0, 0)),
            pl.BlockSpec((1, n_out), lambda i: (0, 0)),
        ]
        out_specs = pl.BlockSpec((tm, n_out), lambda i: (i, 0))
        dims = ("parallel",)
    else:
        tn = n_out if n_out <= tile_n else tile_n
        # Column tiles on the OUTER grid axis: each weight column block is fetched once
        # and stays resident while all row tiles stream past it.
        grid = (pl.cdiv(n_out, tn), pl.cdiv(n, tm))
        in_specs = [
            pl.BlockSpec((tm, k_in), lambda j, i: (i, 0)),
            pl.BlockSpec((k_in, tn), lambda j, i: (0, j)),
            pl.BlockSpec((1, tn), lambda j, i: (0, j)),
        ]
        out_specs = pl.BlockSpec((tm, tn), lambda j, i: (i, j))
        dims = ("parallel", "parallel")

    return pl.pallas_call(
        _linear_kernel,
        out_shape=jax.ShapeDtypeStruct((n, n_out), out_dtype),
        grid=grid,
        in_specs=in_specs,
        out_specs=out_specs,
        compiler_params=pltpu.CompilerParams(dimension_semantics=dims),
    )(x2d, w, b)


def _rel_attn_kernel(q_ref, k_ref, p_ref, v_ref, m_ref, bu_ref, bv_ref, o_ref,
                     kp_ref, vh_ref, *, n_head, d_k, scale, approx_recip,
                     compute_dtype):
    H, D = n_head, d_k

    # ---- per-batch operand prep: built once (t1-tile 0), reused by every T1 tile ----
    # kp_ref[h] = [k_h | p_h]^T  of shape (2D, T2)  -> score matmul is canonical (M,K)x(K,N)
    # vh_ref[h] = v_h            of shape (T2, D)
    @pl.when(pl.program_id(1) == 0)
    def _():
        k = k_ref[0]                       # (T2, H*D) compute_dtype
        p = p_ref[0]                       # (T2, H*D) compute_dtype
        v = v_ref[0]                       # (T2, H*D) compute_dtype
        for h in range(H):
            lo = h * D
            kp_ref[h] = jnp.concatenate(
                [k[:, lo:lo + D].T, p[:, lo:lo + D].T], axis=0)   # (2D, T2)
            vh_ref[h] = v[:, lo:lo + D]                           # (T2, D)

    q = q_ref[0]                           # (tq, H*D) f32
    invalid = m_ref[0] == 0                # (Tm_blk, T2) bool, Tm_blk in {1, tq}
    bu = bu_ref[...]                       # (H, D) f32
    bv = bv_ref[...]                       # (H, D) f32
    neg = jnp.float32(-1e30)               # finite fill: robust for fully-masked rows

    ctx_parts = []
    for h in range(H):                     # static loop over heads; output stays lane-dense
        lo = h * D
        q_h = q[:, lo:lo + D]                                     # (tq, D) f32
        # fold pos-bias adds and 1/sqrt(d_k) into the small (tq, D) tensors
        qu_h = (q_h + bu[h:h + 1, :]) * scale
        qv_h = (q_h + bv[h:h + 1, :]) * scale
        # fused ac+bd: single MXU dot contracting 2D, canonical MKxKN layout
        quv = jnp.concatenate([qu_h, qv_h], axis=-1).astype(compute_dtype)   # (tq, 2D)
        s = jax.lax.dot_general(quv, kp_ref[h],
                                dimension_numbers=(((1,), (0,)), ((), ())),
                                preferred_element_type=jnp.float32)          # (tq, T2)
        s = jnp.where(invalid, neg, s)
        s_max = jnp.max(s, axis=-1, keepdims=True)
        e = jnp.exp(s - s_max)
        denom = jnp.sum(e, axis=-1, keepdims=True)                # >= 1 by construction
        if approx_recip:
            attn = e * pl.reciprocal(denom, approx=True)          # EUP, ~free (bf16 path)
        else:
            attn = e / denom                                      # exact on the f32 path
        # kept for torch masked_fill(mask, 0.0) parity (only matters for fully-masked rows)
        attn = jnp.where(invalid, 0.0, attn)
        ctx_parts.append(
            jnp.dot(attn.astype(compute_dtype), vh_ref[h],
                    preferred_element_type=jnp.float32))          # (tq, D) f32
    # single lane-dense (tq, H*D) store, in compute_dtype
    o_ref[0] = jnp.concatenate(ctx_parts, axis=-1).astype(o_ref.dtype)


def pallas_rel_attention(q, k, p, v, mask_i8, bias_u, bias_v, n_head, d_k,
                         *, compute_dtype):
    """q: (B,T1,H*D) f32; k,v: (B,T2,H*D) cd; p: (Pb,T2,H*D) cd; mask: (B,{1|T1},T2) i8."""
    B, T1, F = q.shape
    T2 = k.shape[1]
    Pb = p.shape[0]
    Tm = mask_i8.shape[1]
    H, D = n_head, d_k
    cd = compute_dtype

    # v5e/v6e (128 MiB VMEM): 256-row T1 tiles amortize per-step overhead and reuse the
    # resident K/P/V scratch over fewer steps; v7x (64 MiB): cap at 128.
    cap = 256 if _vmem_capacity_bytes() >= 100 * 1024 * 1024 else 128
    tile_t1 = T1 if T1 <= cap else cap
    n_t1 = pl.cdiv(T1, tile_t1)

    if Tm == 1:
        m_spec = pl.BlockSpec((1, 1, T2), lambda b, t: (b, 0, 0))
    else:
        m_spec = pl.BlockSpec((1, tile_t1, T2), lambda b, t: (b, t, 0))

    # Pb == 1 -> constant block index: Pallas DMAs p exactly once.
    p_idx = (lambda b, t: (0, 0, 0)) if Pb == 1 else (lambda b, t: (b, 0, 0))

    kern = functools.partial(
        _rel_attn_kernel, n_head=H, d_k=D, scale=1.0 / math.sqrt(D),
        approx_recip=(jnp.dtype(cd) != jnp.dtype(jnp.float32)),
        compute_dtype=cd)

    flops = 2 * B * H * T1 * T2 * (2 * D) + 2 * B * H * T1 * T2 * D
    bytes_accessed = sum(int(a.size) * a.dtype.itemsize
                         for a in (q, k, p, v, mask_i8))
    bytes_accessed += B * T1 * F * jnp.dtype(cd).itemsize
    cost = pl.CostEstimate(flops=int(flops),
                           transcendentals=int(B * H * T1 * T2),
                           bytes_accessed=int(bytes_accessed))

    return pl.pallas_call(
        kern,
        out_shape=jax.ShapeDtypeStruct((B, T1, F), cd),
        grid=(B, n_t1),
        in_specs=[
            pl.BlockSpec((1, tile_t1, F), lambda b, t: (b, t, 0)),   # q (f32)
            pl.BlockSpec((1, T2, F), lambda b, t: (b, 0, 0)),        # k (resident per b)
            pl.BlockSpec((1, T2, F), p_idx),                          # p
            pl.BlockSpec((1, T2, F), lambda b, t: (b, 0, 0)),        # v
            m_spec,                                                   # mask (int8)
            pl.BlockSpec((H, D), lambda b, t: (0, 0)),                # pos_bias_u
            pl.BlockSpec((H, D), lambda b, t: (0, 0)),                # pos_bias_v
        ],
        out_specs=pl.BlockSpec((1, tile_t1, F), lambda b, t: (b, t, 0)),
        scratch_shapes=[
            pltpu.VMEM((H, 2 * D, T2), cd),   # [k_h | p_h]^T, built once per batch
            pltpu.VMEM((H, T2, D), cd),       # v_h slices,     built once per batch
        ],
        compiler_params=pltpu.CompilerParams(
            # T1 axis carries the per-batch scratch dependency -> "arbitrary".
            dimension_semantics=("parallel", "arbitrary"),
            vmem_limit_bytes=64 * 1024 * 1024),
        cost_estimate=cost,
    )(q, k, p, v, mask_i8, bias_u, bias_v)


# ------------------------------ Module wrapper ------------------------------ #

def init_params(key, n_head, n_feat):
    d_k = n_feat // n_head
    ks = jax.random.split(key, 7)

    def xavier(k, shape):
        fan_in, fan_out = shape[0], shape[1]
        lim = math.sqrt(6.0 / (fan_in + fan_out))
        return jax.random.uniform(k, shape, jnp.float32, -lim, lim)

    return {
        # stored already transposed to (In, Out) for y = x @ W
        "wq": xavier(ks[0], (n_feat, n_feat)), "bq": 0.01 * jnp.ones((1, n_feat), jnp.float32),
        "wk": xavier(ks[1], (n_feat, n_feat)), "bk": 0.02 * jnp.ones((1, n_feat), jnp.float32),
        "wv": xavier(ks[2], (n_feat, n_feat)), "bv": 0.03 * jnp.ones((1, n_feat), jnp.float32),
        "wo": xavier(ks[3], (n_feat, n_feat)), "bo": 0.04 * jnp.ones((1, n_feat), jnp.float32),
        "wpos": xavier(ks[4], (n_feat, n_feat)),                       # no bias
        "pos_bias_u": xavier(ks[5], (n_head, d_k)),
        "pos_bias_v": xavier(ks[6], (n_head, d_k)),
    }


def rel_pos_mha_forward(params, query, key, value, pos_emb, mask, n_head,
                        compute_dtype=jnp.bfloat16):
    """Forward pass of RelPositionMultiHeadedAttention (eval mode, empty cache)."""
    B, T1, F = query.shape
    T2 = key.shape[1]
    H = n_head
    D = F // H
    cd = compute_dtype

    # Pre-cast weights / activations once in the wrapper (no in-kernel casting):
    # halves weight+activation DMA on the bf16 path with bit-identical results.
    wq = params["wq"].astype(cd)
    wk = params["wk"].astype(cd)
    wv = params["wv"].astype(cd)
    wo = params["wo"].astype(cd)
    wpos = params["wpos"].astype(cd)
    zero_b = jnp.zeros((1, F), jnp.float32)

    q_in = query.reshape(B * T1, F).astype(cd)
    k_in = key.reshape(B * T2, F).astype(cd)
    v_in = value.reshape(B * T2, F).astype(cd)
    Pb = pos_emb.shape[0]
    p_in = pos_emb.reshape(Pb * T2, F).astype(cd)

    # ---- projections (weight-resident Pallas GEMM); K/V/P emitted in compute_dtype ----
    q = pallas_linear(q_in, wq, params["bq"], out_dtype=jnp.float32).reshape(B, T1, F)
    k = pallas_linear(k_in, wk, params["bk"], out_dtype=cd).reshape(B, T2, F)
    v = pallas_linear(v_in, wv, params["bv"], out_dtype=cd).reshape(B, T2, F)
    p = pallas_linear(p_in, wpos, zero_b, out_dtype=cd).reshape(Pb, T2, F)

    # cache mirrors torch's head-first (B, H, T2, D) layout (eval path, empty cache in);
    # dtype follows compute_dtype for K/V.
    k_heads = jnp.transpose(k.reshape(B, T2, H, D), (0, 2, 1, 3))
    v_heads = jnp.transpose(v.reshape(B, T2, H, D), (0, 2, 1, 3))
    new_cache = (k_heads, v_heads)

    # ---- mask (int8 stream: 4x smaller than int32) ----
    if mask is None or mask.shape[-1] == 0:
        mask_i8 = jnp.ones((B, 1, T2), jnp.int8)       # "fake mask" => no masking
    else:
        mask_i8 = mask.astype(jnp.int8)                # (B, 1, T2) or (B, T1, T2)

    # ---- fused rel-pos attention hot path ----
    ctx = pallas_rel_attention(q, k, p, v, mask_i8,
                               params["pos_bias_u"], params["pos_bias_v"],
                               H, D, compute_dtype=cd)  # (B, T1, H*D) in compute_dtype

    # ---- output projection ----
    out = pallas_linear(ctx.reshape(B * T1, H * D), wo, params["bo"],
                        out_dtype=jnp.float32).reshape(B, T1, F)
    return out, new_cache


# ------------------------------ pure-JAX reference -------------------------- #

def _ref_linear(x, w, b, cd):
    y = jnp.dot(x.astype(cd), w.astype(cd), preferred_element_type=jnp.float32,
                precision=jax.lax.Precision.HIGHEST)
    return y if b is None else y + b


def reference_forward(params, query, key, value, pos_emb, mask, n_head,
                      compute_dtype=jnp.float32):
    """Torch-semantics reference (finite -1e30 fill instead of -inf, see note below)."""
    cd = compute_dtype
    B, T1, F = query.shape
    T2 = key.shape[1]
    H = n_head
    D = F // H
    scale = 1.0 / math.sqrt(D)
    hi = jax.lax.Precision.HIGHEST

    q = _ref_linear(query, params["wq"], params["bq"], cd).reshape(B, T1, H, D)
    k = _ref_linear(key, params["wk"], params["bk"], cd).astype(cd).reshape(B, T2, H, D)
    v = _ref_linear(value, params["wv"], params["bv"], cd).astype(cd).reshape(B, T2, H, D)
    Pb = pos_emb.shape[0]
    p = _ref_linear(pos_emb, params["wpos"], None, cd).astype(cd).reshape(Pb, T2, H, D)
    if Pb == 1:
        p = jnp.broadcast_to(p, (B, T2, H, D))

    qu = ((q + params["pos_bias_u"]) * scale).astype(cd)
    qv = ((q + params["pos_bias_v"]) * scale).astype(cd)

    ac = jnp.einsum("bqhd,bkhd->bhqk", qu, k, preferred_element_type=jnp.float32,
                    precision=hi)
    bd = jnp.einsum("bqhd,bkhd->bhqk", qv, p, preferred_element_type=jnp.float32,
                    precision=hi)
    scores = ac + bd                                        # (B, H, T1, T2) f32

    if mask is not None and mask.shape[-1] > 0:
        inv = (mask == 0)[:, None, :, :]                    # (B, 1, Tm, T2)
        scores = jnp.where(inv, -1e30, scores)
        attn = jax.nn.softmax(scores, axis=-1)
        attn = jnp.where(inv, 0.0, attn)
    else:
        attn = jax.nn.softmax(scores, axis=-1)

    ctx = jnp.einsum("bhqk,bkhd->bqhd", attn.astype(cd), v,
                     preferred_element_type=jnp.float32, precision=hi)
    x = ctx.reshape(B, T1, H * D)
    return _ref_linear(x, params["wo"], params["bo"], cd)


# ----------------------------------- main ----------------------------------- #

if __name__ == "__main__":
    n_head, n_feat = 4, 32
    B, T1, T2 = 2, 8, 8

    root = jax.random.PRNGKey(0)
    k_par, k_q, k_k, k_v, k_p = jax.random.split(root, 5)
    params = init_params(k_par, n_head, n_feat)

    query = jax.random.normal(k_q, (B, T1, n_feat), jnp.float32)
    key = jax.random.normal(k_k, (B, T2, n_feat), jnp.float32)
    value = jax.random.normal(k_v, (B, T2, n_feat), jnp.float32)
    pos_emb = jax.random.normal(k_p, (1, T2, n_feat), jnp.float32)

    # padding-style mask (#batch, 1, time2): batch 0 full, batch 1 length 5
    lengths = jnp.array([T2, 5])
    mask = (jnp.arange(T2)[None, None, :] < lengths[:, None, None])  # bool (B,1,T2)

    # ---- bf16 MXU-feed path (production config on v5e/v6e/v7x) ----
    out_bf, new_cache = rel_pos_mha_forward(params, query, key, value, pos_emb, mask,
                                            n_head, compute_dtype=jnp.bfloat16)
    out_bf = jax.block_until_ready(out_bf)
    assert out_bf.shape == (B, T1, n_feat)
    assert new_cache[0].shape == (B, n_head, T2, n_feat // n_head)
    assert new_cache[1].shape == (B, n_head, T2, n_feat // n_head)
    ref_bf = reference_forward(params, query, key, value, pos_emb, mask, n_head,
                               compute_dtype=jnp.bfloat16)
    assert jnp.allclose(out_bf, ref_bf, atol=3e-2, rtol=3e-2), "bf16 path mismatch"

    # ---- f32 path (tolerance covers MXU default-precision differences vs XLA) ----
    out_f32, _ = rel_pos_mha_forward(params, query, key, value, pos_emb, mask,
                                     n_head, compute_dtype=jnp.float32)
    out_f32 = jax.block_until_ready(out_f32)
    ref_f32 = reference_forward(params, query, key, value, pos_emb, mask, n_head,
                                compute_dtype=jnp.float32)
    assert jnp.allclose(out_f32, ref_f32, atol=2e-2, rtol=2e-2), "f32 path mismatch"

    print("KERNEL_OK")
</pallas_src>

<mosaic_0001>
module attributes {stable_mosaic.version = 11 : i64} {
  func.func @_linear_kernel(%arg0: i32, %arg1: memref<16x32xbf16, #tpu.memory_space<vmem>>, %arg2: memref<32x32xbf16, #tpu.memory_space<vmem>>, %arg3: memref<1x32xf32, #tpu.memory_space<vmem>>, %arg4: memref<16x32xf32, #tpu.memory_space<vmem>>) attributes {dimension_semantics = [#tpu.dimension_semantics<parallel>], iteration_bounds = array<i64: 1>, scalar_prefetch = 0 : i64, scratch_operands = 0 : i64, tpu.core_type = #tpu.core_type<tc>, window_params = [{transform_indices = @transform_0, window_bounds = array<i64: 16, 32>}, {pipeline_mode = #tpu.pipeline_mode<synchronous>, transform_indices = @transform_1, window_bounds = array<i64: 32, 32>}, {pipeline_mode = #tpu.pipeline_mode<synchronous>, transform_indices = @transform_2, window_bounds = array<i64: 1, 32>}, {transform_indices = @transform_3, window_bounds = array<i64: 16, 32>}]} {
    %c0 = arith.constant 0 : index
    %c0_0 = arith.constant 0 : index
    %0 = vector.load %arg1[%c0, %c0_0] : memref<16x32xbf16, #tpu.memory_space<vmem>>, vector<16x32xbf16>
    %c0_1 = arith.constant 0 : index
    %c0_2 = arith.constant 0 : index
    %1 = vector.load %arg2[%c0_1, %c0_2] : memref<32x32xbf16, #tpu.memory_space<vmem>>, vector<32x32xbf16>
    %cst = arith.constant dense<0.000000e+00> : vector<16x32xf32>
    %2 = tpu.matmul %0, %1, %cst {dimension_numbers = #tpu.dot_dimension_numbers<[1], [0], [0], [1], [0, 0, 1, 1], [], []>} : vector<16x32xbf16>, vector<32x32xbf16>, vector<16x32xf32> -> vector<16x32xf32>
    %c0_3 = arith.constant 0 : index
    %c0_4 = arith.constant 0 : index
    %3 = vector.load %arg3[%c0_3, %c0_4] : memref<1x32xf32, #tpu.memory_space<vmem>>, vector<1x32xf32>
    %4 = vector.broadcast %3 : vector<1x32xf32> to vector<16x32xf32>
    %5 = arith.addf %2, %4 : vector<16x32xf32>
    %c0_5 = arith.constant 0 : index
    %c0_6 = arith.constant 0 : index
    %6 = vector.load %arg4[%c0_5, %c0_6] : memref<16x32xf32, #tpu.memory_space<vmem>>, vector<16x32xf32>
    tpu.vector_store %arg4[%c0_5, %c0_6], %5 {strides = array<i32>} : memref<16x32xf32, #tpu.memory_space<vmem>>, vector<16x32xf32>,
    return
  }
  func.func @transform_0(%arg0: i32) -> (i32, i32) {
    %c0_i32 = arith.constant 0 : i32
    %c0_i32_0 = arith.constant 0 : i32
    return %arg0, %c0_i32 : i32, i32
  }
  func.func @transform_1(%arg0: i32) -> (i32, i32) {
    %c0_i32 = arith.constant 0 : i32
    %c0_i32_0 = arith.constant 0 : i32
    %c0_i32_1 = arith.constant 0 : i32
    return %c0_i32, %c0_i32_0 : i32, i32
  }
  func.func @transform_2(%arg0: i32) -> (i32, i32) {
    %c0_i32 = arith.constant 0 : i32
    %c0_i32_0 = arith.constant 0 : i32
    %c0_i32_1 = arith.constant 0 : i32
    return %c0_i32, %c0_i32_0 : i32, i32
  }
  func.func @transform_3(%arg0: i32) -> (i32, i32) {
    %c0_i32 = arith.constant 0 : i32
    %c0_i32_0 = arith.constant 0 : i32
    return %arg0, %c0_i32 : i32, i32
  }
}

</mosaic_0001>

<bundles_post_ra>
// kernel: tpu_custom_call.1
= control target key start
LH: loop header
LB: loop body
LE: loop exit
PB: predicated region body
PF: predicated region fallthrough
CT: control target
= control target key end

     0   :  { %8 = vsyncpa [#allocation3], 0  ;;  %s256_s0 = inlined_call_operand.hbm [shape: bf16[16,32], index: 0, kind: input, shape index: {}]   ;;  %s257_s1 = inlined_call_operand.hbm [shape: bf16[32,32], index: 1, kind: input, shape index: {}]   ;;  %s258_s2 = inlined_call_operand.vmem [shape: f32[1,32], index: 2, kind: input, shape index: {}]   ;;  %s259_s3 = inlined_call_operand.hbm [shape: f32[16,32], index: 3, kind: output, shape index: {}]  }
   0x1   :  { %9 = vsyncpa [#allocation6], 0 }
   0x2   :  { %10 = vsyncpa [#allocation4], 0  ;;  %s15_s14 = sshll.u32 %s256_s0, 4  ;;  %s217_s15 = smov [#allocation2]   ;;  %s16_s14 = int_to_ptr.hbm [resolvable:$true] %s15_s14 }
   0x3   :  { %s17_s16 = sshll.u32 %s217_s15, 4  ;;  %s28_s19 = sshll.u32 %s257_s1, 4  ;;  %s18_s16 = int_to_ptr.vmem [resolvable:$true] %s17_s16  ;;  %s29_s19 = int_to_ptr.hbm [resolvable:$true] %s28_s19 }
   0x4   :  { %s218_s20 = smov 64   ;;  %s219_s21 = smov 4  }
   0x5   :  { %23 = dma.hbm_to_vmem [thread:$0]  %s16_s14, 128, %s18_s16, [#allocation3], %s218_s20, %s218_s20, %s219_s21  }
   0x6   :  { %s220_s22 = smov [#allocation5]  }
   0x7   :  { %s30_s23 = sshll.u32 %s220_s22, 4  ;;  %s31_s23 = int_to_ptr.vmem [resolvable:$true] %s30_s23 }
   0x8   :  { %36 = dma.hbm_to_vmem [thread:$0]  %s29_s19, 256, %s31_s23, [#allocation6], %s218_s20, %s218_s20, %s219_s21  }
   0x9   :  { %211 = dma.done.wait [#allocation3], 128  }
   0xa   :  { %212 = vsyncadd [#allocation3], 4294967168 }
   0xb   :  { %213 = dma.done.wait [#allocation6], 256  }
   0xc   :  { %214 = vsyncadd [#allocation6], 4294967040  ;;  %v130_v0 = vld [vmem:[#allocation5 + $0x8] sm:$0xff]  ;;  %v129_v1 = vld [vmem:[#allocation5] sm:$0xff]  ;;  %vm75_vm0 = vcmask 261120   ;;  %s221_s24 = smov [#allocation7]  }
   0xd   :  { %85 = vmatpush.bf16.msra.mxu0 %v130_v0  ;;  %v128_v2 = vld [vmem:[#allocation2] sm:$0xff]  ;;  %s99_s25 = sshll.u32 %s221_s24, 4  ;;  %s101_s28 = sshll.u32 %s259_s3, 4  ;;  %s100_s25 = int_to_ptr.vmem [resolvable:$true] %s99_s25  ;;  %s102_s28 = int_to_ptr.hbm [resolvable:$true] %s101_s28 }
   0xe   :  { %v138_v3 = vld [vmem:[%s258_s2] ss:$0 sm:$0xff]  ;;  %s222_s29 = smov 128   ;;  %s223_s30 = smov 8  }
  0x11   :  { %86 = vmatpush.bf16.msra.mxu0 %v129_v1 }
  0x14   :  { %127 = vmatmul.msk.bf16.vlgmr.msra.gmra.mxu0 %vm75_vm0, %v128_v2 }
  0x91   :  { %v88_v4 = vpop.f32.mrf.mxu0 }
  0x92   :  { %v89_v5 = vadd.f32 %v138_v3, %v88_v4 }
  0x94   :  { %93 = vst.msk [vmem:[#allocation7] sm:$0xff] %vm75_vm0, %v89_v5 }
  0x99   :  { %v90_v6 = vpop.f32.mrf.mxu0 }
  0x9a   :  { %v91_v7 = vadd.f32 %v138_v3, %v90_v6 }
  0x9c   :  { %94 = vst.msk [vmem:[#allocation7 + $0x8] sm:$0xff] %vm75_vm0, %v91_v7 }
  0x9d   :  { %107 = dma.vmem_to_hbm [thread:$0]  %s100_s25, 256, %s102_s28, [#allocation4], %s222_s29, %s222_s29, %s223_s30  }
  0x9e   :  { %215 = dma.done.wait [#allocation4], 256  }
  0x9f   :  { %216 = vsyncadd [#allocation4], 4294967040 }
  0xa0   :  { %112 = vsyncpa [#allocation3], 1 }
  0xa1   :  { %113 = vsyncpa [#allocation6], 1 }
  0xa2   :  { %114 = vsyncpa [#allocation4], 1 }

</bundles_post_ra>
